<compile_context>
chip_gen: v7x
topology: tpu7x:2x2x1
jax: 0.10.0
libtpu: 0.0.40
codegen_flags: <defaults>
</compile_context>

<pallas_src>
import jax
import jax.numpy as jnp
from jax.experimental import pallas as pl
from jax.experimental.pallas import tpu as pltpu


def _dma_identity_kernel(p_hbm_ref, o_hbm_ref, dma_sem):
    # ParameterModule.forward: output == parameter.
    # Pure bandwidth: one HBM->HBM DMA descriptor. No vreg bounce, no grid.
    copy = pltpu.make_async_copy(p_hbm_ref, o_hbm_ref, dma_sem)
    copy.start()
    copy.wait()


def parameter_module_forward(parameter: jax.Array, x=None) -> jax.Array:
    """Production hot path: ParameterModule.forward is an identity on the parameter."""
    del x  # ignored, exactly like the PyTorch module
    return parameter


def parameter_module_forward_pallas(parameter: jax.Array, x=None, *, donate: bool = False) -> jax.Array:
    """Pallas implementation: materializes the parameter via a single HBM->HBM DMA.

    `x` is accepted for API parity and ignored. With `donate=True` the caller
    states the original buffer may be reused — rewriting the same bytes in
    place would be a no-op that still moves 2x total_bytes over HBM, so we
    just return the parameter (bit-identical result, zero traffic).
    """
    del x
    if donate:
        return parameter

    orig_shape = parameter.shape
    # DMA copies arbitrary-rank arrays; only guard the 0-D corner case.
    p = parameter.reshape(1) if parameter.ndim == 0 else parameter
    total_bytes = p.size * jnp.dtype(p.dtype).itemsize

    out = pl.pallas_call(
        _dma_identity_kernel,
        out_shape=jax.ShapeDtypeStruct(p.shape, p.dtype),
        in_specs=[pl.BlockSpec(memory_space=pl.ANY)],
        out_specs=pl.BlockSpec(memory_space=pl.ANY),
        scratch_shapes=[pltpu.SemaphoreType.DMA(())],
        cost_estimate=pl.CostEstimate(
            flops=0, transcendentals=0, bytes_accessed=2 * total_bytes),
    )(p)
    return out.reshape(orig_shape)


if __name__ == "__main__":
    key = jax.random.PRNGKey(0)
    k_param, k_odd, k_big, k_x = jax.random.split(key, 4)

    # "nn.Parameter" of shape (8, 128) — one vreg — plus an NCHW-style input
    # that forward() ignores (x=None is allowed too).
    parameter = jax.random.normal(k_param, (8, 128), dtype=jnp.float32)
    x = jax.random.normal(k_x, (2, 4, 16, 16), dtype=jnp.float32)
    expected = jax.device_get(parameter)

    # 1) Hot path: identity, no kernel, no copy.
    out_fast = parameter_module_forward(parameter, x)
    assert out_fast is parameter

    # 2) Pallas path, single HBM->HBM DMA.
    out = jax.block_until_ready(parameter_module_forward_pallas(parameter, x))
    assert out.shape == parameter.shape and out.dtype == parameter.dtype
    assert bool(jnp.array_equal(out, jnp.asarray(expected)))

    # 3) donate=True: semantically identical, returns the parameter directly.
    out_donated = parameter_module_forward_pallas(parameter, donate=True)
    assert out_donated is parameter

    # 4) Awkward shape (odd last dim, bf16) — DMA path has no lane/sublane
    #    constraints, no reshaping tricks needed.
    odd = jax.random.normal(k_odd, (9, 7), dtype=jnp.float32).astype(jnp.bfloat16)
    expected_odd = jax.device_get(odd)
    out_odd = jax.block_until_ready(parameter_module_forward_pallas(odd))
    assert out_odd.shape == odd.shape and out_odd.dtype == odd.dtype
    assert bool(jnp.array_equal(out_odd, jnp.asarray(expected_odd)))

    # 5) Scalar parameter.
    scalar = jnp.asarray(3.25, dtype=jnp.float32)
    out_scalar = jax.block_until_ready(parameter_module_forward_pallas(scalar))
    assert out_scalar.shape == () and bool(out_scalar == scalar)

    # 6) Larger parameter (8 MiB) — still a single DMA, no VMEM budget concerns
    #    on any generation (v5e / v6e / v7x).
    big = jax.random.normal(k_big, (2048, 1024), dtype=jnp.float32)
    expected_big = jax.device_get(big)
    out_big = jax.block_until_ready(parameter_module_forward_pallas(big))
    assert out_big.shape == big.shape and out_big.dtype == big.dtype
    assert bool(jnp.array_equal(out_big, jnp.asarray(expected_big)))

    # 7) Works under jit as well.
    jitted = jax.jit(parameter_module_forward_pallas)
    out_jit = jax.block_until_ready(jitted(parameter))
    assert bool(jnp.array_equal(out_jit, jnp.asarray(expected)))

    print("KERNEL_OK")
</pallas_src>

<mosaic_0001>
module attributes {stable_mosaic.version = 11 : i64} {
  func.func @_dma_identity_kernel(%arg0: memref<8x128xf32, #tpu.memory_space<any>>, %arg1: memref<8x128xf32, #tpu.memory_space<any>>, %arg2: memref<!tpu.dma_semaphore, #tpu.memory_space<semaphore_mem>>) attributes {dimension_semantics = [], scalar_prefetch = 0 : i64, scratch_operands = 1 : i64, tpu.core_type = #tpu.core_type<tc>} {
    tpu.enqueue_dma source(%arg0 : memref<8x128xf32, #tpu.memory_space<any>>) target(%arg1 : memref<8x128xf32, #tpu.memory_space<any>>) target_semaphore(%arg2 : memref<!tpu.dma_semaphore, #tpu.memory_space<semaphore_mem>>)
    tpu.wait_dma2 semaphore(%arg2 : memref<!tpu.dma_semaphore, #tpu.memory_space<semaphore_mem>>) src(%arg0 : memref<8x128xf32, #tpu.memory_space<any>>) dst(%arg1 : memref<8x128xf32, #tpu.memory_space<any>>)
    return
  }
}

</mosaic_0001>

<bundles_post_ra>
// kernel: tpu_custom_call.1
= control target key start
LH: loop header
LB: loop body
LE: loop exit
PB: predicated region body
PF: predicated region fallthrough
CT: control target
= control target key end

     0   :  { %s34_s6 = smov [#allocation2]   ;;  %s35_s7 = smov [#allocation3]   ;;  %s53_s0 = inlined_call_operand.hbm [shape: f32[8,128], index: 0, kind: input, shape index: {}]   ;;  %s54_s1 = inlined_call_operand.hbm [shape: f32[8,128], index: 1, kind: output, shape index: {}]  }
   0x1   :  { %s36_s8 = smov 0  }
   0x2   :  { %18 = dma.general %s53_s0, 128, %s54_s1, %s34_s6, %s35_s7, [#allocation4], %s36_s8, 0  }
   0x3   :  { %32 = dma.done.wait [#allocation2], 128 }
   0x4   :  { %33 = vsyncadd [#allocation2], 4294967168 }
   0x5   :  { %22 = vsyncmov [#allocation2] }
   0x8   :  { %s23_s13 = vpop.sfrf %22 }
   0x9   :  { %p28_p0 = scmp.ne.s32.totalorder %s23_s13, 0 }
   0xb   :  { %27 = shalt.err (%p28_p0)  }

</bundles_post_ra>
